<compile_context>
chip_gen: v6e
topology: v6e:2x2x1
jax: 0.10.0
libtpu: 0.0.40
codegen_flags: <defaults>
</compile_context>

<pallas_src>
import functools

import jax
import jax.numpy as jnp
from jax import lax
from jax.experimental import pallas as pl
from jax.experimental.pallas import tpu as pltpu


def _round_up(x: int, m: int) -> int:
    return (x + m - 1) // m * m


def _lora_linear_kernel(x_ref, w_ref, b_ref, a_ref, blora_ref, o_ref,
                        acc_ref, xa_ref, *, scaling: float):
    """One (i, j, k) grid step.

    x_ref     : [tm, tk]       activations tile
    w_ref     : [tn, tk]       frozen weight tile (native [N, K] layout)
    b_ref     : [1,  tn]       bias tile
    a_ref     : [Rp, tk]       lora_A tile (native [R, K] layout, R padded to 128)
    blora_ref : [tn, Rp]       lora_B tile (native [N, R] layout)
    o_ref     : [tm, tn]       output tile
    acc_ref   : [tm, tn] f32   base-matmul accumulator (persists across k)
    xa_ref    : [tm, Rp] f32   x @ A^T accumulator (persists across k)
    """
    k = pl.program_id(2)

    @pl.when(k == 0)
    def _init():
        acc_ref[...] = jnp.zeros_like(acc_ref)
        xa_ref[...] = jnp.zeros_like(xa_ref)

    x = x_ref[...]
    # Contract the K axis of x against the K axis of the native-layout weights;
    # no transpose is ever materialized in HBM or VMEM.
    dn = (((1,), (1,)), ((), ()))

    # Frozen base linear: x @ W^T (accumulated over K tiles).
    acc_ref[...] += lax.dot_general(x, w_ref[...], dn,
                                    preferred_element_type=jnp.float32)
    # LoRA down-projection: x @ A^T (R << N, so the per-N-tile recompute is
    # negligible and keeps the scratch usage core-local / megacore-safe).
    xa_ref[...] += lax.dot_general(x, a_ref[...], dn,
                                   preferred_element_type=jnp.float32)

    @pl.when(k == pl.num_programs(2) - 1)
    def _finalize():
        # Scale the small [tm, R] intermediate, not the [tm, tn] result.
        xa = xa_ref[...] * scaling
        lora = lax.dot_general(xa, blora_ref[...].astype(jnp.float32), dn,
                               preferred_element_type=jnp.float32)
        out = acc_ref[...] + b_ref[...].astype(jnp.float32) + lora
        o_ref[...] = out.astype(o_ref.dtype)


@functools.partial(jax.jit, static_argnames=("alpha", "tm", "tn", "tk"))
def lora_linear_forward(x, weight, bias, lora_A, lora_B, *, alpha: float = 16.0,
                        tm=None, tn=None, tk=None):
    """y = x @ W^T + b + (x @ A^T @ B^T) * (alpha / rank).

    x: [M, K]; weight: [N, K]; bias: [N]; lora_A: [R, K]; lora_B: [N, R]
    (all weights in native PyTorch layouts - no transposes anywhere).
    """
    M, K = x.shape
    N = weight.shape[0]
    R = lora_A.shape[0]
    scaling = float(alpha) / float(R)

    # Tile sizes: lane-dense (128-multiples on the lane axis), 8-aligned on the
    # sublane axis, sized well under the scoped-VMEM default (fits v5e/v6e/v7x).
    if tm is None:
        tm = min(256, _round_up(M, 8))
    if tn is None:
        tn = min(256, _round_up(N, 128))
    if tk is None:
        tk = min(512, _round_up(K, 128))
    Rp = _round_up(R, 128)          # lane-dense [M, R] intermediate

    Mp, Np, Kp = _round_up(M, tm), _round_up(N, tn), _round_up(K, tk)

    # Zero-pad to tile multiples. For production shapes already aligned to
    # 128/tiles this is a no-op; zero padding contributes nothing to the dots.
    def pad2(a, r, c):
        if (r, c) == a.shape:
            return a
        return jnp.pad(a, ((0, r - a.shape[0]), (0, c - a.shape[1])))

    xp = pad2(x, Mp, Kp)
    wp = pad2(weight, Np, Kp)
    ap = pad2(lora_A, Rp, Kp)
    blp = pad2(lora_B, Np, Rp)
    biasp = (jnp.pad(bias, (0, Np - N)) if Np != N else bias).reshape(1, Np)

    grid = (Mp // tm, Np // tn, Kp // tk)
    kernel = functools.partial(_lora_linear_kernel, scaling=scaling)

    out = pl.pallas_call(
        kernel,
        out_shape=jax.ShapeDtypeStruct((Mp, Np), x.dtype),
        grid_spec=pltpu.PrefetchScalarGridSpec(
            num_scalar_prefetch=0,
            grid=grid,
            in_specs=[
                pl.BlockSpec((tm, tk), lambda i, j, k: (i, k)),   # x
                pl.BlockSpec((tn, tk), lambda i, j, k: (j, k)),   # W  (native [N,K])
                pl.BlockSpec((1, tn), lambda i, j, k: (0, j)),    # bias
                pl.BlockSpec((Rp, tk), lambda i, j, k: (0, k)),   # lora_A (native [R,K])
                pl.BlockSpec((tn, Rp), lambda i, j, k: (j, 0)),   # lora_B (native [N,R])
            ],
            out_specs=pl.BlockSpec((tm, tn), lambda i, j, k: (i, j)),
            scratch_shapes=[
                pltpu.VMEM((tm, tn), jnp.float32),   # base accumulator
                pltpu.VMEM((tm, Rp), jnp.float32),   # x @ A^T accumulator
            ],
        ),
        compiler_params=pltpu.CompilerParams(
            dimension_semantics=("parallel", "parallel", "arbitrary")),
    )(xp, wp, biasp, ap, blp)

    return out[:M, :N]


if __name__ == "__main__":
    # Small shapes consistent with the module: batch=2, seq=8, in=32, out=32, rank=16.
    # (At this size the kernel is a correctness harness; the tiling only pays off
    #  at production K/N in the thousands.)
    batch, seq, in_features, out_features, rank, alpha = 2, 8, 32, 32, 16, 16.0

    key = jax.random.PRNGKey(0)
    k_x, k_w, k_b, k_a, k_bb = jax.random.split(key, 5)

    x = jax.random.normal(k_x, (batch, seq, in_features), dtype=jnp.float32)

    # Deterministic parameter init (shapes from nn.Linear / LoRALayer.__init__).
    weight = jax.random.normal(k_w, (out_features, in_features), jnp.float32) * 0.1
    bias = jax.random.normal(k_b, (out_features,), jnp.float32) * 0.1
    lora_A = jax.random.normal(k_a, (rank, in_features), jnp.float32) * 0.01
    # Module inits lora_B to zeros; use small random values here so the LoRA
    # matmul path is actually exercised numerically.
    lora_B = jax.random.normal(k_bb, (out_features, rank), jnp.float32) * 0.01

    # TODO(synk): training-mode dropout on the LoRA branch (nn.Dropout(0.1)) is not
    # implemented; eval-mode identity is what the kernel computes.
    x2d = x.reshape(batch * seq, in_features)   # flatten tokens -> rows
    out2d = lora_linear_forward(x2d, weight, bias, lora_A, lora_B, alpha=alpha)
    out = out2d.reshape(batch, seq, out_features)
    jax.block_until_ready(out)

    # Pure-JAX reference check.
    scaling = alpha / rank
    ref = (x @ weight.T + bias) + (x @ lora_A.T @ lora_B.T) * scaling
    assert jnp.allclose(out, ref, atol=1e-4, rtol=1e-4), "mismatch vs reference"

    print("KERNEL_OK")
</pallas_src>

<mosaic_0001>
module attributes {stable_mosaic.version = 11 : i64} {
  func.func @_lora_linear_kernel(%arg0: i32, %arg1: i32, %arg2: i32, %arg3: memref<16x128xf32, #tpu.memory_space<vmem>>, %arg4: memref<128x128xf32, #tpu.memory_space<vmem>>, %arg5: memref<1x128xf32, #tpu.memory_space<vmem>>, %arg6: memref<128x128xf32, #tpu.memory_space<vmem>>, %arg7: memref<128x128xf32, #tpu.memory_space<vmem>>, %arg8: memref<16x128xf32, #tpu.memory_space<vmem>>, %arg9: memref<16x128xf32, #tpu.memory_space<vmem>>, %arg10: memref<16x128xf32, #tpu.memory_space<vmem>>) attributes {dimension_semantics = [#tpu.dimension_semantics<parallel>, #tpu.dimension_semantics<parallel>, #tpu.dimension_semantics<arbitrary>], iteration_bounds = array<i64: 1, 1, 1>, scalar_prefetch = 0 : i64, scratch_operands = 2 : i64, tpu.core_type = #tpu.core_type<tc>, window_params = [{transform_indices = @transform_0, window_bounds = array<i64: 16, 128>}, {transform_indices = @transform_1, window_bounds = array<i64: 128, 128>}, {transform_indices = @transform_2, window_bounds = array<i64: 1, 128>}, {transform_indices = @transform_3, window_bounds = array<i64: 128, 128>}, {transform_indices = @transform_4, window_bounds = array<i64: 128, 128>}, {transform_indices = @transform_5, window_bounds = array<i64: 16, 128>}]} {
    %c0_i32 = arith.constant 0 : i32
    %0 = arith.cmpi eq, %arg2, %c0_i32 : i32
    %1 = arith.extui %0 : i1 to i32
    %c0_i32_0 = arith.constant 0 : i32
    %2 = arith.cmpi ne, %1, %c0_i32_0 : i32
    scf.if %2 {
      %cst_17 = arith.constant 0.000000e+00 : f32
      %17 = vector.broadcast %cst_17 : f32 to vector<16x128xf32>
      %c0_18 = arith.constant 0 : index
      %c0_19 = arith.constant 0 : index
      %18 = vector.load %arg9[%c0_18, %c0_19] : memref<16x128xf32, #tpu.memory_space<vmem>>, vector<16x128xf32>
      tpu.vector_store %arg9[%c0_18, %c0_19], %17 {strides = array<i32>} : memref<16x128xf32, #tpu.memory_space<vmem>>, vector<16x128xf32>,
      %cst_20 = arith.constant 0.000000e+00 : f32
      %19 = vector.broadcast %cst_20 : f32 to vector<16x128xf32>
      %c0_21 = arith.constant 0 : index
      %c0_22 = arith.constant 0 : index
      %20 = vector.load %arg10[%c0_21, %c0_22] : memref<16x128xf32, #tpu.memory_space<vmem>>, vector<16x128xf32>
      tpu.vector_store %arg10[%c0_21, %c0_22], %19 {strides = array<i32>} : memref<16x128xf32, #tpu.memory_space<vmem>>, vector<16x128xf32>,
    } else {
    }
    %c0 = arith.constant 0 : index
    %c0_1 = arith.constant 0 : index
    %3 = vector.load %arg3[%c0, %c0_1] : memref<16x128xf32, #tpu.memory_space<vmem>>, vector<16x128xf32>
    %c0_2 = arith.constant 0 : index
    %c0_3 = arith.constant 0 : index
    %4 = vector.load %arg9[%c0_2, %c0_3] : memref<16x128xf32, #tpu.memory_space<vmem>>, vector<16x128xf32>
    %c0_4 = arith.constant 0 : index
    %c0_5 = arith.constant 0 : index
    %5 = vector.load %arg4[%c0_4, %c0_5] : memref<128x128xf32, #tpu.memory_space<vmem>>, vector<128x128xf32>
    %cst = arith.constant dense<0.000000e+00> : vector<16x128xf32>
    %6 = tpu.matmul %3, %5, %cst {dimension_numbers = #tpu.dot_dimension_numbers<[1], [1], [0], [0], [0, 0, 1, 0], [], []>} : vector<16x128xf32>, vector<128x128xf32>, vector<16x128xf32> -> vector<16x128xf32>
    %7 = arith.addf %4, %6 : vector<16x128xf32>
    %c0_6 = arith.constant 0 : index
    %c0_7 = arith.constant 0 : index
    %8 = vector.load %arg9[%c0_6, %c0_7] : memref<16x128xf32, #tpu.memory_space<vmem>>, vector<16x128xf32>
    tpu.vector_store %arg9[%c0_6, %c0_7], %7 {strides = array<i32>} : memref<16x128xf32, #tpu.memory_space<vmem>>, vector<16x128xf32>,
    %c0_8 = arith.constant 0 : index
    %c0_9 = arith.constant 0 : index
    %9 = vector.load %arg10[%c0_8, %c0_9] : memref<16x128xf32, #tpu.memory_space<vmem>>, vector<16x128xf32>
    %c0_10 = arith.constant 0 : index
    %c0_11 = arith.constant 0 : index
    %10 = vector.load %arg6[%c0_10, %c0_11] : memref<128x128xf32, #tpu.memory_space<vmem>>, vector<128x128xf32>
    %cst_12 = arith.constant dense<0.000000e+00> : vector<16x128xf32>
    %11 = tpu.matmul %3, %10, %cst_12 {dimension_numbers = #tpu.dot_dimension_numbers<[1], [1], [0], [0], [0, 0, 1, 0], [], []>} : vector<16x128xf32>, vector<128x128xf32>, vector<16x128xf32> -> vector<16x128xf32>
    %12 = arith.addf %9, %11 : vector<16x128xf32>
    %c0_13 = arith.constant 0 : index
    %c0_14 = arith.constant 0 : index
    %13 = vector.load %arg10[%c0_13, %c0_14] : memref<16x128xf32, #tpu.memory_space<vmem>>, vector<16x128xf32>
    tpu.vector_store %arg10[%c0_13, %c0_14], %12 {strides = array<i32>} : memref<16x128xf32, #tpu.memory_space<vmem>>, vector<16x128xf32>,
    %c0_i32_15 = arith.constant 0 : i32
    %14 = arith.cmpi eq, %arg2, %c0_i32_15 : i32
    %15 = arith.extui %14 : i1 to i32
    %c0_i32_16 = arith.constant 0 : i32
    %16 = arith.cmpi ne, %15, %c0_i32_16 : i32
    scf.if %16 {
      %c0_17 = arith.constant 0 : index
      %c0_18 = arith.constant 0 : index
      %17 = vector.load %arg10[%c0_17, %c0_18] : memref<16x128xf32, #tpu.memory_space<vmem>>, vector<16x128xf32>
      %cst_19 = arith.constant 1.000000e+00 : f32
      %18 = vector.broadcast %cst_19 : f32 to vector<16x128xf32>
      %19 = arith.mulf %17, %18 : vector<16x128xf32>
      %c0_20 = arith.constant 0 : index
      %c0_21 = arith.constant 0 : index
      %20 = vector.load %arg7[%c0_20, %c0_21] : memref<128x128xf32, #tpu.memory_space<vmem>>, vector<128x128xf32>
      %cst_22 = arith.constant dense<0.000000e+00> : vector<16x128xf32>
      %21 = tpu.matmul %19, %20, %cst_22 {dimension_numbers = #tpu.dot_dimension_numbers<[1], [1], [0], [0], [0, 0, 1, 0], [], []>} : vector<16x128xf32>, vector<128x128xf32>, vector<16x128xf32> -> vector<16x128xf32>
      %c0_23 = arith.constant 0 : index
      %c0_24 = arith.constant 0 : index
      %22 = vector.load %arg9[%c0_23, %c0_24] : memref<16x128xf32, #tpu.memory_space<vmem>>, vector<16x128xf32>
      %c0_25 = arith.constant 0 : index
      %c0_26 = arith.constant 0 : index
      %23 = vector.load %arg5[%c0_25, %c0_26] : memref<1x128xf32, #tpu.memory_space<vmem>>, vector<1x128xf32>
      %24 = vector.broadcast %23 : vector<1x128xf32> to vector<16x128xf32>
      %25 = arith.addf %22, %24 : vector<16x128xf32>
      %26 = arith.addf %25, %21 : vector<16x128xf32>
      %c0_27 = arith.constant 0 : index
      %c0_28 = arith.constant 0 : index
      %27 = vector.load %arg8[%c0_27, %c0_28] : memref<16x128xf32, #tpu.memory_space<vmem>>, vector<16x128xf32>
      tpu.vector_store %arg8[%c0_27, %c0_28], %26 {strides = array<i32>} : memref<16x128xf32, #tpu.memory_space<vmem>>, vector<16x128xf32>,
    } else {
    }
    return
  }
  func.func @transform_0(%arg0: i32, %arg1: i32, %arg2: i32) -> (i32, i32) {
    %c0_i32 = arith.constant 0 : i32
    return %arg0, %arg2 : i32, i32
  }
  func.func @transform_1(%arg0: i32, %arg1: i32, %arg2: i32) -> (i32, i32) {
    %c0_i32 = arith.constant 0 : i32
    return %arg1, %arg2 : i32, i32
  }
  func.func @transform_2(%arg0: i32, %arg1: i32, %arg2: i32) -> (i32, i32) {
    %c0_i32 = arith.constant 0 : i32
    %c0_i32_0 = arith.constant 0 : i32
    return %c0_i32, %arg1 : i32, i32
  }
  func.func @transform_3(%arg0: i32, %arg1: i32, %arg2: i32) -> (i32, i32) {
    %c0_i32 = arith.constant 0 : i32
    %c0_i32_0 = arith.constant 0 : i32
    return %c0_i32, %arg2 : i32, i32
  }
  func.func @transform_4(%arg0: i32, %arg1: i32, %arg2: i32) -> (i32, i32) {
    %c0_i32 = arith.constant 0 : i32
    %c0_i32_0 = arith.constant 0 : i32
    return %arg1, %c0_i32 : i32, i32
  }
  func.func @transform_5(%arg0: i32, %arg1: i32, %arg2: i32) -> (i32, i32) {
    %c0_i32 = arith.constant 0 : i32
    return %arg0, %arg1 : i32, i32
  }
}

</mosaic_0001>

<bundles_post_ra>
// kernel: lora_linear_forward.1
= control target key start
LH: loop header
LB: loop body
LE: loop exit
PB: predicated region body
PF: predicated region fallthrough
CT: control target
= control target key end

     0   :  { %s726_s0 = inlined_call_operand.vmem [shape: f32[16,128], index: 0, kind: input, shape index: {}]   ;;  %s727_s1 = inlined_call_operand.vmem [shape: f32[128,128], index: 1, kind: input, shape index: {}]   ;;  %s728_s2 = inlined_call_operand.vmem [shape: f32[1,128], index: 2, kind: input, shape index: {}]   ;;  %s729_s3 = inlined_call_operand.vmem [shape: f32[128,128], index: 3, kind: input, shape index: {}]   ;;  %s730_s4 = inlined_call_operand.vmem [shape: f32[128,128], index: 4, kind: input, shape index: {}]   ;;  %s731_s5 = inlined_call_operand.hbm [shape: f32[16,128], index: 5, kind: output, shape index: {}]  }
   0x1   :  { %v145_v0 = vld [vmem:[%s729_s3 + $0x78] sm:$0xff]  ;;  %v144_v1 = vld [vmem:[%s729_s3 + $0x70] sm:$0xff]  ;;  %v143_v2 = vld [vmem:[%s729_s3 + $0x68] sm:$0xff] }
   0x2   :  { %442 = vmatprep.subr.mxu1 %v145_v0  ;;  %v29_v3 = vld [vmem:[%s726_s0] sm:$0xff]  ;;  %v48_v4 = vld [vmem:[%s727_s1 + $0x78] sm:$0xff]  ;;  %v47_v5 = vld [vmem:[%s727_s1 + $0x70] sm:$0xff] }
   0x3   :  { %443 = vmatpush3.xpose.msra.mxu1 %v145_v0  ;;  %474 = vmatprep.mubr.f32.mxu1 %v29_v3  ;;  %v142_v6 = vld [vmem:[%s729_s3 + $0x60] sm:$0xff]  ;;  %v46_v7 = vld [vmem:[%s727_s1 + $0x68] sm:$0xff]  ;;  %v141_v8 = vld [vmem:[%s729_s3 + $0x58] sm:$0xff] }
   0x4   :  { %444 = vmatprep.subr.mxu1 %v144_v1  ;;  %407 = vmatprep.subr.mxu0 %v48_v4  ;;  %v45_v9 = vld [vmem:[%s727_s1 + $0x60] sm:$0xff]  ;;  %v140_v10 = vld [vmem:[%s729_s3 + $0x50] sm:$0xff] }
   0x5   :  { %408 = vmatpush3.xpose.msra.mxu0 %v48_v4  ;;  %439 = vmatprep.mubr.f32.mxu0 %v29_v3 }
   0x6   :  { %409 = vmatprep.subr.mxu0 %v47_v5 }
   0x7   :  { %445 = vmatpush3.xpose.msra.mxu1 %v144_v1 }
   0x8   :  { %446 = vmatprep.subr.mxu1 %v143_v2 }
   0x9   :  { %410 = vmatpush3.xpose.msra.mxu0 %v47_v5 }
   0xa   :  { %411 = vmatprep.subr.mxu0 %v46_v7 }
   0xb   :  { %447 = vmatpush3.xpose.msra.mxu1 %v143_v2 }
   0xc   :  { %448 = vmatprep.subr.mxu1 %v142_v6 }
   0xd   :  { %412 = vmatpush3.xpose.msra.mxu0 %v46_v7 }
   0xf   :  { %449 = vmatpush3.xpose.msra.mxu1 %v142_v6 }
  0x10   :  { %450 = vmatprep.subr.mxu1 %v141_v8 }
  0x11   :  { %10 = vsyncpa [#allocation5], 0  ;;  %413 = vmatprep.subr.mxu0 %v45_v9  ;;  %v44_v11 = vld [vmem:[%s727_s1 + $0x58] sm:$0xff]  ;;  %v139_v12 = vld [vmem:[%s729_s3 + $0x48] sm:$0xff] }
  0x12   :  { %414 = vmatpush3.xpose.msra.mxu0 %v45_v9  ;;  %v43_v13 = vld [vmem:[%s727_s1 + $0x50] sm:$0xff]  ;;  %v138_v14 = vld [vmem:[%s729_s3 + $0x40] sm:$0xff]  ;;  %v42_v15 = vld [vmem:[%s727_s1 + $0x48] sm:$0xff] }
  0x13   :  { %451 = vmatpush3.xpose.msra.mxu1 %v141_v8  ;;  %415 = vmatprep.subr.mxu0 %v44_v11  ;;  %v137_v16 = vld [vmem:[%s729_s3 + $0x38] sm:$0xff]  ;;  %v41_v17 = vld [vmem:[%s727_s1 + $0x40] sm:$0xff]  ;;  %v136_v18 = vld [vmem:[%s729_s3 + $0x30] sm:$0xff] }
  0x14   :  { %452 = vmatprep.subr.mxu1 %v140_v10  ;;  %v40_v19 = vld [vmem:[%s727_s1 + $0x38] sm:$0xff]  ;;  %v135_v20 = vld [vmem:[%s729_s3 + $0x28] sm:$0xff]  ;;  %v39_v21 = vld [vmem:[%s727_s1 + $0x30] sm:$0xff] }
  0x15   :  { %v134_v22 = vld [vmem:[%s729_s3 + $0x20] sm:$0xff]  ;;  %v38_v23 = vld [vmem:[%s727_s1 + $0x28] sm:$0xff]  ;;  %v133_v24 = vld [vmem:[%s729_s3 + $0x18] sm:$0xff] }
  0x16   :  { %416 = vmatpush3.xpose.msra.mxu0 %v44_v11  ;;  %v37_v25 = vld [vmem:[%s727_s1 + $0x20] sm:$0xff]  ;;  %v132_v26 = vld [vmem:[%s729_s3 + $0x10] sm:$0xff]  ;;  %v36_v27 = vld [vmem:[%s727_s1 + $0x18] sm:$0xff] }
  0x17   :  { %453 = vmatpush3.xpose.msra.mxu1 %v140_v10  ;;  %417 = vmatprep.subr.mxu0 %v43_v13  ;;  %v131_v28 = vld [vmem:[%s729_s3 + $0x8] sm:$0xff]  ;;  %v35_v29 = vld [vmem:[%s727_s1 + $0x10] sm:$0xff]  ;;  %v130_v30 = vld [vmem:[%s729_s3] sm:$0xff] }
  0x18   :  { %454 = vmatprep.subr.mxu1 %v139_v12  ;;  %v34_v31 = vld [vmem:[%s727_s1 + $0x8] sm:$0xff]  ;;  %v33_v33 = vld [vmem:[%s727_s1] sm:$0xff]  ;;  %v245_v34 = vld [vmem:[%s730_s4 + $0x78] sm:$0xff]  ;;  %s537_s1 = smov [#allocation4]  }
  0x19   :  { %v30_v32 = vld [vmem:[%s726_s0 + $0x8] sm:$0xff]  ;;  %v244_v35 = vld [vmem:[%s730_s4 + $0x70] sm:$0xff]  ;;  %v242_v37 = vld [vmem:[%s730_s4 + $0x60] sm:$0xff]  ;;  %s341_s15 = sshll.u32 %s537_s1, 4  ;;  %s342_s15 = int_to_ptr.vmem [resolvable:$true] %s341_s15 }
  0x1a   :  { %418 = vmatpush3.xpose.msra.mxu0 %v43_v13  ;;  %v243_v36 = vld [vmem:[%s730_s4 + $0x68] sm:$0xff]  ;;  %v241_v38 = vld [vmem:[%s730_s4 + $0x58] sm:$0xff]  ;;  %v240_v39 = vld [vmem:[%s730_s4 + $0x50] sm:$0xff]  ;;  %p520_p1 = scmp.lt.s32.totalorder %s342_s15, %s342_s15 }
  0x1b   :  { %455 = vmatpush3.xpose.msra.mxu1 %v139_v12  ;;  %419 = vmatprep.subr.mxu0 %v42_v15  ;;  %v239_v40 = vld [vmem:[%s730_s4 + $0x48] sm:$0xff]  ;;  %v238_v41 = vld [vmem:[%s730_s4 + $0x40] sm:$0xff]  ;;  %v237_v42 = vld [vmem:[%s730_s4 + $0x38] sm:$0xff] }
  0x1c   :  { %456 = vmatprep.subr.mxu1 %v138_v14  ;;  %v236_v43 = vld [vmem:[%s730_s4 + $0x30] sm:$0xff]  ;;  %v235_v44 = vld [vmem:[%s730_s4 + $0x28] sm:$0xff]  ;;  %v234_v45 = vld [vmem:[%s730_s4 + $0x20] sm:$0xff] }
  0x1d   :  { %v233_v46 = vld [vmem:[%s730_s4 + $0x18] sm:$0xff]  ;;  %v232_v47 = vld [vmem:[%s730_s4 + $0x10] sm:$0xff]  ;;  %v231_v48 = vld [vmem:[%s730_s4 + $0x8] sm:$0xff] }
  0x1e   :  { %420 = vmatpush3.xpose.msra.mxu0 %v42_v15  ;;  %v230_v49 = vld [vmem:[%s730_s4] sm:$0xff]  ;;  %s515_s4 = scalar_lea.vmem %s342_s15, 256 }
  0x1f   :  { %457 = vmatpush3.xpose.msra.mxu1 %v138_v14  ;;  %421 = vmatprep.subr.mxu0 %v41_v17  ;;  %v352_v53 = vld [vmem:[%s728_s2] ss:$0 sm:$0xff]  ;;  %p516_p0 = scmp.ne.s32.totalorder %s342_s15, %s515_s4  ;;  %p521_p2 = scmp.lt.s32.totalorder %s515_s4, %s515_s4 }
  0x20   :  { %458 = vmatprep.subr.mxu1 %v137_v16 }
  0x21   :  { %p522_p3 = por %p521_p2, %p520_p1 }
  0x22   :  { %422 = vmatpush3.xpose.msra.mxu0 %v41_v17 }
  0x23   :  { %459 = vmatpush3.xpose.msra.mxu1 %v137_v16  ;;  %423 = vmatprep.subr.mxu0 %v40_v19  ;;  %p523_p4 = pnand %p522_p3, %p516_p0 }
  0x24   :  { %460 = vmatprep.subr.mxu1 %v136_v18 }
  0x26   :  { %424 = vmatpush3.xpose.msra.mxu0 %v40_v19 }
  0x27   :  { %461 = vmatpush3.xpose.msra.mxu1 %v136_v18  ;;  %425 = vmatprep.subr.mxu0 %v39_v21 }
  0x28   :  { %462 = vmatprep.subr.mxu1 %v135_v20 }
  0x2a   :  { %426 = vmatpush3.xpose.msra.mxu0 %v39_v21 }
  0x2b   :  { %463 = vmatpush3.xpose.msra.mxu1 %v135_v20  ;;  %427 = vmatprep.subr.mxu0 %v38_v23 }
  0x2c   :  { %464 = vmatprep.subr.mxu1 %v134_v22 }
  0x2e   :  { %428 = vmatpush3.xpose.msra.mxu0 %v38_v23 }
  0x2f   :  { %465 = vmatpush3.xpose.msra.mxu1 %v134_v22  ;;  %429 = vmatprep.subr.mxu0 %v37_v25 }
  0x30   :  { %466 = vmatprep.subr.mxu1 %v133_v24 }
  0x32   :  { %430 = vmatpush3.xpose.msra.mxu0 %v37_v25 }
  0x33   :  { %467 = vmatpush3.xpose.msra.mxu1 %v133_v24  ;;  %431 = vmatprep.subr.mxu0 %v36_v27 }
  0x34   :  { %468 = vmatprep.subr.mxu1 %v132_v26 }
  0x36   :  { %432 = vmatpush3.xpose.msra.mxu0 %v36_v27 }
  0x37   :  { %469 = vmatpush3.xpose.msra.mxu1 %v132_v26  ;;  %433 = vmatprep.subr.mxu0 %v35_v29 }
  0x38   :  { %470 = vmatprep.subr.mxu1 %v131_v28 }
  0x3a   :  { %434 = vmatpush3.xpose.msra.mxu0 %v35_v29 }
  0x3b   :  { %471 = vmatpush3.xpose.msra.mxu1 %v131_v28  ;;  %435 = vmatprep.subr.mxu0 %v34_v31 }
  0x3c   :  { %472 = vmatprep.subr.mxu1 %v130_v30 }
  0x3e   :  { %436 = vmatpush3.xpose.msra.mxu0 %v34_v31 }
  0x3f   :  { %473 = vmatpush3.xpose.msra.mxu1 %v130_v30  ;;  %437 = vmatprep.subr.mxu0 %v33_v33 }
  0x42   :  { %475 = vmatmul.mubr.f32.vlgmr.msra.gmra.mxu1 %v30_v32  ;;  %438 = vmatpush3.xpose.msra.mxu0 %v33_v33 }
  0x43   :  { %477 = vmatprep.subr.mxu0 %v245_v34 }
  0x45   :  { %440 = vmatmul.mubr.f32.vlgmr.msra.gmra.mxu0 %v30_v32 }
  0x46   :  { %478 = vmatpush3.xpose.msra.mxu0 %v245_v34 }
  0x47   :  { %479 = vmatprep.subr.mxu0 %v244_v35 }
  0x4a   :  { %480 = vmatpush3.xpose.msra.mxu0 %v244_v35 }
  0x4b   :  { %481 = vmatprep.subr.mxu0 %v243_v36 }
  0x4e   :  { %482 = vmatpush3.xpose.msra.mxu0 %v243_v36 }
  0x4f   :  { %483 = vmatprep.subr.mxu0 %v242_v37 }
  0x52   :  { %484 = vmatpush3.xpose.msra.mxu0 %v242_v37 }
  0x53   :  { %485 = vmatprep.subr.mxu0 %v241_v38 }
  0x56   :  { %486 = vmatpush3.xpose.msra.mxu0 %v241_v38 }
  0x57   :  { %487 = vmatprep.subr.mxu0 %v240_v39 }
  0x5a   :  { %488 = vmatpush3.xpose.msra.mxu0 %v240_v39 }
  0x5b   :  { %489 = vmatprep.subr.mxu0 %v239_v40 }
  0x5e   :  { %490 = vmatpush3.xpose.msra.mxu0 %v239_v40 }
  0x5f   :  { %491 = vmatprep.subr.mxu0 %v238_v41 }
  0x62   :  { %492 = vmatpush3.xpose.msra.mxu0 %v238_v41 }
  0x63   :  { %493 = vmatprep.subr.mxu0 %v237_v42 }
  0x66   :  { %494 = vmatpush3.xpose.msra.mxu0 %v237_v42 }
  0x67   :  { %495 = vmatprep.subr.mxu0 %v236_v43 }
  0x6a   :  { %496 = vmatpush3.xpose.msra.mxu0 %v236_v43 }
  0x6b   :  { %497 = vmatprep.subr.mxu0 %v235_v44 }
  0x6e   :  { %498 = vmatpush3.xpose.msra.mxu0 %v235_v44 }
  0x6f   :  { %499 = vmatprep.subr.mxu0 %v234_v45 }
  0x72   :  { %500 = vmatpush3.xpose.msra.mxu0 %v234_v45 }
  0x73   :  { %501 = vmatprep.subr.mxu0 %v233_v46 }
  0x76   :  { %502 = vmatpush3.xpose.msra.mxu0 %v233_v46 }
  0x77   :  { %503 = vmatprep.subr.mxu0 %v232_v47 }
  0x7a   :  { %504 = vmatpush3.xpose.msra.mxu0 %v232_v47 }
  0x7b   :  { %505 = vmatprep.subr.mxu0 %v231_v48 }
  0x7e   :  { %506 = vmatpush3.xpose.msra.mxu0 %v231_v48 }
  0x7f   :  { %507 = vmatprep.subr.mxu0 %v230_v49 }
  0x82   :  { %508 = vmatpush3.xpose.msra.mxu0 %v230_v49 }
 0x102   :  { %v476_v50 = vpop.f32.mrf.mxu1 }
 0x104   :  { %v212_v51 = vpop.f32.mrf.mxu1 }
 0x105   :  { %509 = vmatprep.mubr.f32.mxu0 %v212_v51  ;;  %v441_v52 = vpop.f32.mrf.mxu0 }
 0x106   :  { %510 = vmatmul.mubr.f32.vlgmr.msra.gmra.mxu0 %v476_v50  ;;  %v331_v55 = vadd.f32 %v441_v52, %v352_v53 }
 0x107   :  { %v115_v54 = vpop.f32.mrf.mxu0 }
 0x108   :  { %v330_v57 = vadd.f32 %v352_v53, %v115_v54 }
 0x1c6   :  { %v511_v56 = vpop.f32.mrf.mxu0 }
 0x1c7   :  { %v333_v58 = vadd.f32 %v511_v56, %v331_v55 }
 0x1c8   :  { %v312_v59 = vpop.f32.mrf.mxu0 }
 0x1c9   :  { %335 = vst [vmem:[#allocation4 + $0x8] sm:$0xff] %v333_v58  ;;  %v332_v60 = vadd.f32 %v330_v57, %v312_v59 }
 0x1cb   :  { %334 = vst [vmem:[#allocation4] sm:$0xff] %v332_v60 }
 0x1cc   :  { %526 = shalt.err (!%p523_p4)
}
 0x1cd   :  { %s538_s2 = smov 128   ;;  %s539_s16 = smov 8  }
 0x1ce   :  { %347 = dma.vmem_to_hbm [thread:$0]  %s342_s15, 256, %s731_s5, [#allocation5], %s538_s2, %s538_s2, %s539_s16  }
 0x1cf   :  { %535 = dma.done.wait [#allocation5], 256  }
 0x1d0   :  { %536 = vsyncadd [#allocation5], 4294967040 }
 0x1d1   :  { %351 = vsyncpa [#allocation5], 1 }

</bundles_post_ra>
